<compile_context>
chip_gen: v7x
topology: tpu7x:2x2x1
jax: 0.10.0
libtpu: 0.0.40
codegen_flags: <defaults>
</compile_context>

<pallas_src>
import functools

import jax
import jax.numpy as jnp
from jax import lax
from jax.experimental import pallas as pl
from jax.experimental.pallas import tpu as pltpu


def _round_up(x, m):
    return ((x + m - 1) // m) * m


# --------------------------------------------------------------------------
# Kernel 1: conv-as-matmul + bias, plus per-block partial BN statistics.
# Every output block index depends on the grid step i, so the M axis is safe
# to mark "parallel" (megacore on v7x).
# --------------------------------------------------------------------------
def _conv_partial_stats_kernel(p_ref, w_ref, b_ref, y_ref, psum_ref, psq_ref,
                               *, tm, m_valid, needs_mask):
    i = pl.program_id(0)

    # im2col matmul on the MXU: bf16 operands, f32 accumulation.
    y = jnp.dot(p_ref[...], w_ref[...], preferred_element_type=jnp.float32)
    y = y + b_ref[...]
    y_ref[...] = y.astype(y_ref.dtype)

    def _write_stats(yv):
        psum_ref[...] = jnp.sum(yv, axis=0, keepdims=True).reshape(1, 1, -1)
        psq_ref[...] = jnp.sum(yv * yv, axis=0, keepdims=True).reshape(1, 1, -1)

    if needs_mask:
        # Only the last tile contains M-padding rows; keep the iota/compare/
        # select off the hot path of all full tiles.
        last = pl.num_programs(0) - 1

        @pl.when(i != last)
        def _():
            _write_stats(y)

        @pl.when(i == last)
        def _():
            row = i * tm + lax.broadcasted_iota(jnp.int32, (tm, 1), 0)
            _write_stats(jnp.where(row < m_valid, y, 0.0))
    else:
        _write_stats(y)


# --------------------------------------------------------------------------
# Kernel 2: folded BN affine (single FMA) + LeakyReLU(0.2).  Memory-bound.
# --------------------------------------------------------------------------
def _bn_lrelu_kernel(y_ref, scale_ref, shift_ref, o_ref, *, slope):
    yh = y_ref[...].astype(jnp.float32) * scale_ref[...] + shift_ref[...]
    o_ref[...] = jnp.where(yh >= 0, yh, slope * yh).astype(o_ref.dtype)


def conv_block_forward(x, conv_w, conv_b, bn_gamma, bn_beta, *, stride, padding,
                       eps=1e-5, negative_slope=0.2, tm=512):
    n, c_in, h, w = x.shape
    c_out, _, kh, kw = conv_w.shape
    h_out = (h + 2 * padding - kh) // stride + 1
    w_out = (w + 2 * padding - kw) // stride + 1
    m = n * h_out * w_out
    k = c_in * kh * kw

    # ---- im2col in NHWC-contiguous order (K order = (kh, kw, c_in)) --------
    # Single NCHW->NHWC transpose of the input; each (ih, jw) offset is a
    # channel-contiguous strided slice, concatenated along the last axis, so
    # the final reshape to (M, K) is a cheap contiguous copy.
    x_nhwc = jnp.transpose(x, (0, 2, 3, 1))
    x_pad = jnp.pad(x_nhwc,
                    ((0, 0), (padding, padding), (padding, padding), (0, 0)))
    slabs = []
    for ih in range(kh):
        for jw in range(kw):
            slabs.append(x_pad[:, ih:ih + stride * (h_out - 1) + 1:stride,
                               jw:jw + stride * (w_out - 1) + 1:stride, :])
    patches = jnp.concatenate(slabs, axis=-1)       # [N, H_out, W_out, kh*kw*C]
    patches = patches.reshape(m, k)

    # ---- padding to MXU/lane-friendly sizes --------------------------------
    k_pad = _round_up(k, 128)
    c_out_pad = _round_up(c_out, 128)
    tm = min(_round_up(tm, 128), _round_up(m, 128))
    m_pad = _round_up(m, tm)
    needs_mask = (m_pad != m)

    # bf16 MXU operands (accumulation stays f32 inside the kernel).
    patches = patches.astype(jnp.bfloat16)
    patches = jnp.pad(patches, ((0, m_pad - m), (0, k_pad - k)))

    # weight: (C_out, C_in, kh, kw) -> (kh, kw, C_in, C_out) so K order matches
    # the patch layout above.
    w2 = jnp.transpose(conv_w, (2, 3, 1, 0)).reshape(k, c_out)
    w2 = jnp.pad(w2.astype(jnp.bfloat16), ((0, k_pad - k), (0, c_out_pad - c_out)))
    b2 = jnp.pad(conv_b.astype(jnp.float32),
                 (0, c_out_pad - c_out)).reshape(1, c_out_pad)

    grid = (m_pad // tm,)
    num_blocks = grid[0]

    # Explicit VMEM budget: double-buffered in/out tiles, with 2x headroom,
    # capped well under the v7x 64 MiB per-core VMEM.
    est = 2 * (tm * k_pad * 2 + k_pad * c_out_pad * 2 + c_out_pad * 4
               + tm * c_out_pad * 4 + 2 * c_out_pad * 4)
    vmem_limit = int(min(48 << 20, max(16 << 20, 2 * est)))

    kern1 = functools.partial(_conv_partial_stats_kernel, tm=tm, m_valid=m,
                              needs_mask=needs_mask)
    y, psum, psq = pl.pallas_call(
        kern1,
        out_shape=(jax.ShapeDtypeStruct((m_pad, c_out_pad), jnp.float32),
                   jax.ShapeDtypeStruct((num_blocks, 1, c_out_pad), jnp.float32),
                   jax.ShapeDtypeStruct((num_blocks, 1, c_out_pad), jnp.float32)),
        grid_spec=pltpu.PrefetchScalarGridSpec(
            num_scalar_prefetch=0,
            grid=grid,
            in_specs=[pl.BlockSpec((tm, k_pad), lambda i: (i, 0)),
                      pl.BlockSpec((k_pad, c_out_pad), lambda i: (0, 0)),
                      pl.BlockSpec((1, c_out_pad), lambda i: (0, 0))],
            out_specs=[pl.BlockSpec((tm, c_out_pad), lambda i: (i, 0)),
                       pl.BlockSpec((1, 1, c_out_pad), lambda i: (i, 0, 0)),
                       pl.BlockSpec((1, 1, c_out_pad), lambda i: (i, 0, 0))]),
        compiler_params=pltpu.CompilerParams(
            dimension_semantics=("parallel",),
            vmem_limit_bytes=vmem_limit),
    )(patches, w2, b2)

    # ---- tiny (num_blocks, C) reduction + BN affine fold in plain JAX ------
    total = jnp.sum(psum[:, 0, :], axis=0, keepdims=True)
    total_sq = jnp.sum(psq[:, 0, :], axis=0, keepdims=True)
    mean = total / m
    var = jnp.maximum(total_sq / m - mean * mean, 0.0)   # biased (train mode)
    invstd = lax.rsqrt(var + eps)
    gamma_p = jnp.pad(bn_gamma.astype(jnp.float32),
                      (0, c_out_pad - c_out)).reshape(1, c_out_pad)
    beta_p = jnp.pad(bn_beta.astype(jnp.float32),
                     (0, c_out_pad - c_out)).reshape(1, c_out_pad)
    scale = gamma_p * invstd
    shift = beta_p - mean * scale

    kern2 = functools.partial(_bn_lrelu_kernel, slope=negative_slope)
    out = pl.pallas_call(
        kern2,
        out_shape=jax.ShapeDtypeStruct((m_pad, c_out_pad), jnp.float32),
        grid_spec=pltpu.PrefetchScalarGridSpec(
            num_scalar_prefetch=0,
            grid=grid,
            in_specs=[pl.BlockSpec((tm, c_out_pad), lambda i: (i, 0)),
                      pl.BlockSpec((1, c_out_pad), lambda i: (0, 0)),
                      pl.BlockSpec((1, c_out_pad), lambda i: (0, 0))],
            out_specs=pl.BlockSpec((tm, c_out_pad), lambda i: (i, 0))),
        compiler_params=pltpu.CompilerParams(
            dimension_semantics=("parallel",),
            vmem_limit_bytes=vmem_limit),
    )(y, scale, shift)

    # Back to NCHW to match the PyTorch module.
    # TODO(synk): this final NHWC->NCHW transpose is a full extra HBM round
    # trip; return NHWC (or fuse into the consumer) when the caller allows.
    out = out[:m, :c_out].reshape(n, h_out, w_out, c_out).transpose(0, 3, 1, 2)
    return out


def _reference(x, conv_w, conv_b, gamma, beta, stride, padding,
               eps=1e-5, slope=0.2):
    y = lax.conv_general_dilated(
        x, conv_w, (stride, stride),
        [(padding, padding), (padding, padding)],
        dimension_numbers=('NCHW', 'OIHW', 'NCHW'))
    y = y + conv_b.reshape(1, -1, 1, 1)
    mean = y.mean(axis=(0, 2, 3), keepdims=True)
    var = ((y - mean) ** 2).mean(axis=(0, 2, 3), keepdims=True)   # biased
    yh = (y - mean) / jnp.sqrt(var + eps)
    yh = yh * gamma.reshape(1, -1, 1, 1) + beta.reshape(1, -1, 1, 1)
    return jnp.where(yh >= 0, yh, slope * yh)


if __name__ == "__main__":
    key = jax.random.PRNGKey(0)
    k1, k2, k3, k4, k5 = jax.random.split(key, 5)

    N, C_IN, H, W = 2, 4, 16, 16
    C_OUT, KS, STRIDE, PAD = 16, 3, 2, 1

    x = jax.random.normal(k1, (N, C_IN, H, W), jnp.float32)
    conv_w = 0.1 * jax.random.normal(k2, (C_OUT, C_IN, KS, KS), jnp.float32)
    conv_b = 0.1 * jax.random.normal(k3, (C_OUT,), jnp.float32)
    bn_gamma = 1.0 + 0.1 * jax.random.normal(k4, (C_OUT,), jnp.float32)
    bn_beta = 0.1 * jax.random.normal(k5, (C_OUT,), jnp.float32)

    out = conv_block_forward(x, conv_w, conv_b, bn_gamma, bn_beta,
                             stride=STRIDE, padding=PAD)
    out = jax.block_until_ready(out)

    ref = _reference(x, conv_w, conv_b, bn_gamma, bn_beta, STRIDE, PAD)
    assert out.shape == ref.shape, (out.shape, ref.shape)
    # Tolerance accounts for bf16 MXU operands (accumulation in f32).
    if not jnp.allclose(out, ref, atol=3e-2, rtol=3e-2):
        max_err = float(jnp.max(jnp.abs(out - ref)))
        raise AssertionError(f"Pallas output mismatch, max abs err {max_err}")

    # TODO(synk): BatchNorm2d running_mean/running_var update (training-mode
    # side effect) is not modeled; it does not affect the forward output.
    print("KERNEL_OK")
</pallas_src>

<mosaic_0001>
module attributes {stable_mosaic.version = 11 : i64} {
  func.func @_conv_partial_stats_kernel(%arg0: i32, %arg1: memref<128x128xbf16, #tpu.memory_space<vmem>>, %arg2: memref<128x128xbf16, #tpu.memory_space<vmem>>, %arg3: memref<1x128xf32, #tpu.memory_space<vmem>>, %arg4: memref<128x128xf32, #tpu.memory_space<vmem>>, %arg5: memref<1x1x128xf32, #tpu.memory_space<vmem>>, %arg6: memref<1x1x128xf32, #tpu.memory_space<vmem>>) attributes {dimension_semantics = [#tpu.dimension_semantics<parallel>], iteration_bounds = array<i64: 1>, scalar_prefetch = 0 : i64, scratch_operands = 0 : i64, tpu.core_type = #tpu.core_type<tc>, window_params = [{transform_indices = @transform_0, window_bounds = array<i64: 128, 128>}, {pipeline_mode = #tpu.pipeline_mode<synchronous>, transform_indices = @transform_1, window_bounds = array<i64: 128, 128>}, {pipeline_mode = #tpu.pipeline_mode<synchronous>, transform_indices = @transform_2, window_bounds = array<i64: 1, 128>}, {transform_indices = @transform_3, window_bounds = array<i64: 128, 128>}, {transform_indices = @transform_4, window_bounds = array<i64: 1, 1, 128>}, {transform_indices = @transform_5, window_bounds = array<i64: 1, 1, 128>}]} {
    %c0 = arith.constant 0 : index
    %c0_0 = arith.constant 0 : index
    %0 = vector.load %arg1[%c0, %c0_0] : memref<128x128xbf16, #tpu.memory_space<vmem>>, vector<128x128xbf16>
    %c0_1 = arith.constant 0 : index
    %c0_2 = arith.constant 0 : index
    %1 = vector.load %arg2[%c0_1, %c0_2] : memref<128x128xbf16, #tpu.memory_space<vmem>>, vector<128x128xbf16>
    %cst = arith.constant dense<0.000000e+00> : vector<128x128xf32>
    %2 = tpu.matmul %0, %1, %cst {dimension_numbers = #tpu.dot_dimension_numbers<[1], [0], [0], [1], [0, 0, 1, 1], [], []>} : vector<128x128xbf16>, vector<128x128xbf16>, vector<128x128xf32> -> vector<128x128xf32>
    %c0_3 = arith.constant 0 : index
    %c0_4 = arith.constant 0 : index
    %3 = vector.load %arg3[%c0_3, %c0_4] : memref<1x128xf32, #tpu.memory_space<vmem>>, vector<1x128xf32>
    %4 = vector.broadcast %3 : vector<1x128xf32> to vector<128x128xf32>
    %5 = arith.addf %2, %4 : vector<128x128xf32>
    %c0_5 = arith.constant 0 : index
    %c0_6 = arith.constant 0 : index
    %6 = vector.load %arg4[%c0_5, %c0_6] : memref<128x128xf32, #tpu.memory_space<vmem>>, vector<128x128xf32>
    tpu.vector_store %arg4[%c0_5, %c0_6], %5 {strides = array<i32>} : memref<128x128xf32, #tpu.memory_space<vmem>>, vector<128x128xf32>,
    %cst_7 = arith.constant dense<0.000000e+00> : vector<128xf32>
    %7 = vector.multi_reduction <add>, %5, %cst_7 [0] : vector<128x128xf32> to vector<128xf32>
    %8 = vector.shape_cast %7 : vector<128xf32> to vector<1x128xf32>
    %9 = vector.shape_cast %8 : vector<1x128xf32> to vector<1x1x128xf32>
    %c0_8 = arith.constant 0 : index
    %c0_9 = arith.constant 0 : index
    %c0_10 = arith.constant 0 : index
    %10 = vector.load %arg5[%c0_8, %c0_9, %c0_10] : memref<1x1x128xf32, #tpu.memory_space<vmem>>, vector<1x1x128xf32>
    tpu.vector_store %arg5[%c0_8, %c0_9, %c0_10], %9 {strides = array<i32>} : memref<1x1x128xf32, #tpu.memory_space<vmem>>, vector<1x1x128xf32>,
    %11 = arith.mulf %5, %5 : vector<128x128xf32>
    %cst_11 = arith.constant dense<0.000000e+00> : vector<128xf32>
    %12 = vector.multi_reduction <add>, %11, %cst_11 [0] : vector<128x128xf32> to vector<128xf32>
    %13 = vector.shape_cast %12 : vector<128xf32> to vector<1x128xf32>
    %14 = vector.shape_cast %13 : vector<1x128xf32> to vector<1x1x128xf32>
    %c0_12 = arith.constant 0 : index
    %c0_13 = arith.constant 0 : index
    %c0_14 = arith.constant 0 : index
    %15 = vector.load %arg6[%c0_12, %c0_13, %c0_14] : memref<1x1x128xf32, #tpu.memory_space<vmem>>, vector<1x1x128xf32>
    tpu.vector_store %arg6[%c0_12, %c0_13, %c0_14], %14 {strides = array<i32>} : memref<1x1x128xf32, #tpu.memory_space<vmem>>, vector<1x1x128xf32>,
    return
  }
  func.func @transform_0(%arg0: i32) -> (i32, i32) {
    %c0_i32 = arith.constant 0 : i32
    %c0_i32_0 = arith.constant 0 : i32
    return %arg0, %c0_i32 : i32, i32
  }
  func.func @transform_1(%arg0: i32) -> (i32, i32) {
    %c0_i32 = arith.constant 0 : i32
    %c0_i32_0 = arith.constant 0 : i32
    %c0_i32_1 = arith.constant 0 : i32
    return %c0_i32, %c0_i32_0 : i32, i32
  }
  func.func @transform_2(%arg0: i32) -> (i32, i32) {
    %c0_i32 = arith.constant 0 : i32
    %c0_i32_0 = arith.constant 0 : i32
    %c0_i32_1 = arith.constant 0 : i32
    return %c0_i32, %c0_i32_0 : i32, i32
  }
  func.func @transform_3(%arg0: i32) -> (i32, i32) {
    %c0_i32 = arith.constant 0 : i32
    %c0_i32_0 = arith.constant 0 : i32
    return %arg0, %c0_i32 : i32, i32
  }
  func.func @transform_4(%arg0: i32) -> (i32, i32, i32) {
    %c0_i32 = arith.constant 0 : i32
    %c0_i32_0 = arith.constant 0 : i32
    %c0_i32_1 = arith.constant 0 : i32
    return %arg0, %c0_i32, %c0_i32_0 : i32, i32, i32
  }
  func.func @transform_5(%arg0: i32) -> (i32, i32, i32) {
    %c0_i32 = arith.constant 0 : i32
    %c0_i32_0 = arith.constant 0 : i32
    %c0_i32_1 = arith.constant 0 : i32
    return %arg0, %c0_i32, %c0_i32_0 : i32, i32, i32
  }
}

</mosaic_0001>

<bundles_post_ra>
// kernel: tpu_custom_call.1
= control target key start
LH: loop header
LB: loop body
LE: loop exit
PB: predicated region body
PF: predicated region fallthrough
CT: control target
= control target key end

     0   :  { %11 = vsyncpa [#allocation3], 0  ;;  %s772_s0 = inlined_call_operand.hbm [shape: bf16[128,128], index: 0, kind: input, shape index: {}]   ;;  %s773_s1 = inlined_call_operand.hbm [shape: bf16[128,128], index: 1, kind: input, shape index: {}]   ;;  %s774_s2 = inlined_call_operand.vmem [shape: f32[1,128], index: 2, kind: input, shape index: {}]   ;;  %s775_s3 = inlined_call_operand.hbm [shape: f32[128,128], index: 3, kind: output, shape index: {0}]   ;;  %s776_s4 = inlined_call_operand.hbm [shape: f32[1,1,128], index: 4, kind: output, shape index: {1}]   ;;  %s777_s5 = inlined_call_operand.hbm [shape: f32[1,1,128], index: 5, kind: output, shape index: {2}]  }
   0x1   :  { %12 = vsyncpa [#allocation6], 0 }
   0x2   :  { %13 = vsyncpa [#allocation4], 0 }
   0x3   :  { %14 = vsyncpa [#allocation9], 0  ;;  %s625_s18 = smov [#allocation2]   ;;  %s507_s22 = scalar_lea.hbm %s772_s0, 1024 }
   0x4   :  { %s20_s19 = sshll.u32 %s625_s18, 4  ;;  %p508_p0 = scmp.ne.s32.totalorder %s772_s0, %s507_s22  ;;  %s21_s19 = int_to_ptr.vmem [resolvable:$true] %s20_s19 }
   0x5   :  { %p511_p1 = scmp.lt.u32.totalorder %s507_s22, %s772_s0 }
   0x7   :  { %p513_p2 = pnand %p511_p1, %p508_p0 }
   0x9   :  { %516 = shalt.err (!%p513_p2)
}
   0xa   :  { %s517_s27 = scalar_lea.vmem %s21_s19, 1024  ;;  %p522_p4 = scmp.lt.s32.totalorder %s21_s19, %s21_s19 }
   0xb   :  { %p518_p3 = scmp.ne.s32.totalorder %s21_s19, %s517_s27  ;;  %p523_p5 = scmp.lt.s32.totalorder %s517_s27, %s517_s27 }
   0xd   :  { %p524_p6 = por %p523_p5, %p522_p4 }
   0xf   :  { %p525_p7 = pnand %p524_p6, %p518_p3 }
  0x11   :  { %528 = shalt.err (!%p525_p7)
}
  0x12   :  { %s626_s28 = smov 64   ;;  %s627_s29 = smov 4  }
  0x13   :  { %26 = dma.hbm_to_vmem [thread:$0]  %s772_s0, 1024, %s21_s19, [#allocation3], %s626_s28, %s626_s28, %s627_s29  }
  0x14   :  { %s628_s7 = smov [#allocation5]   ;;  %s529_s11 = scalar_lea.hbm %s773_s1, 1024 }
  0x15   :  { %s32_s8 = sshll.u32 %s628_s7, 4  ;;  %p530_p8 = scmp.ne.s32.totalorder %s773_s1, %s529_s11  ;;  %s33_s8 = int_to_ptr.vmem [resolvable:$true] %s32_s8 }
  0x16   :  { %p533_p9 = scmp.lt.u32.totalorder %s529_s11, %s773_s1 }
  0x18   :  { %p535_p10 = pnand %p533_p9, %p530_p8 }
  0x1a   :  { %538 = shalt.err (!%p535_p10)
}
  0x1b   :  { %s539_s16 = scalar_lea.vmem %s33_s8, 1024  ;;  %p544_p12 = scmp.lt.s32.totalorder %s33_s8, %s33_s8 }
  0x1c   :  { %p540_p11 = scmp.ne.s32.totalorder %s33_s8, %s539_s16  ;;  %p545_p13 = scmp.lt.s32.totalorder %s539_s16, %s539_s16 }
  0x1e   :  { %p546_p0 = por %p545_p13, %p544_p12 }
  0x20   :  { %p547_p1 = pnand %p546_p0, %p540_p11 }
  0x22   :  { %550 = shalt.err (!%p547_p1)
}
  0x23   :  { %38 = dma.hbm_to_vmem [thread:$0]  %s773_s1, 1024, %s33_s8, [#allocation6], %s626_s28, %s626_s28, %s627_s29  }
  0x24   :  { %617 = dma.done.wait [#allocation3], 1024  }
  0x25   :  { %618 = vsyncadd [#allocation3], 4294966272 }
  0x26   :  { %619 = dma.done.wait [#allocation6], 1024  }
  0x27   :  { %620 = vsyncadd [#allocation6], 4294966272  ;;  %v491_v0 = vld [vmem:[#allocation5] sm:$0xff]   ;;  %v492_v1 = vld [vmem:[#allocation5 + $0x8] sm:$0xff]  }
  0x28   :  { %434 = vmatprep.subr.bf16.mxu0 %v491_v0  ;;  %466 = vmatprep.subr.bf16.mxu1 %v491_v0  ;;  %v493_v2 = vld [vmem:[#allocation5 + $0x10] sm:$0xff]   ;;  %v494_v3 = vld [vmem:[#allocation5 + $0x18] sm:$0xff]   ;;  %v499_v4 = vld [vmem:[#allocation2] sm:$0xff]  }
  0x29   :  { %435 = vmatpush3.bf16.msra.mxu0 %v491_v0  ;;  %474 = vmatpush3.bf16.msra.mxu1 %v491_v0  ;;  %v495_v5 = vld [vmem:[#allocation5 + $0x20] sm:$0xff]   ;;  %v496_v7 = vld [vmem:[#allocation5 + $0x28] sm:$0xff]   ;;  %v497_v8 = vld [vmem:[#allocation5 + $0x30] sm:$0xff]  }
  0x2a   :  { %436 = vmatprep.subr.bf16.mxu0 %v492_v1  ;;  %467 = vmatprep.subr.bf16.mxu1 %v492_v1  ;;  %v503_v6 = vld [vmem:[#allocation2 + $0x20] sm:$0xff]   ;;  %v498_v9 = vld [vmem:[#allocation5 + $0x38] sm:$0xff]   ;;  %v500_v10 = vld [vmem:[#allocation2 + $0x8] sm:$0xff]  }
  0x2b   :  { %450 = vmatprep.mubr.bf16.mxu0 %v499_v4  ;;  %458 = vmatprep.mubr.bf16.mxu1 %v503_v6  ;;  %v504_v11 = vld [vmem:[#allocation2 + $0x28] sm:$0xff]   ;;  %v501_v12 = vld [vmem:[#allocation2 + $0x10] sm:$0xff]   ;;  %v502_v14 = vld [vmem:[#allocation2 + $0x18] sm:$0xff]  }
  0x2c   :  { %v505_v13 = vld [vmem:[#allocation2 + $0x30] sm:$0xff]   ;;  %v506_v15 = vld [vmem:[#allocation2 + $0x38] sm:$0xff]   ;;  %v401_v16 = vld [vmem:[%s774_s2] ss:$0 sm:$0xff]  ;;  %s629_s2 = smov [#allocation7]  }
  0x2d   :  { %437 = vmatpush3.bf16.msra.mxu0 %v492_v1  ;;  %475 = vmatpush3.bf16.msra.mxu1 %v492_v1  ;;  %s361_s19 = sshll.u32 %s629_s2, 4  ;;  %s706_s19 = int_to_ptr.vmem [resolvable:$true] %s361_s19 }
  0x2e   :  { %438 = vmatprep.subr.bf16.mxu0 %v493_v2  ;;  %468 = vmatprep.subr.bf16.mxu1 %v493_v2  ;;  %s551_s20 = scalar_lea.vmem %s706_s19, 2048  ;;  %p556_p3 = scmp.lt.s32.totalorder %s706_s19, %s706_s19 }
  0x2f   :  { %p552_p2 = scmp.ne.s32.totalorder %s706_s19, %s551_s20  ;;  %p557_p4 = scmp.lt.s32.totalorder %s551_s20, %s551_s20 }
  0x31   :  { %439 = vmatpush3.bf16.msra.mxu0 %v493_v2  ;;  %476 = vmatpush3.bf16.msra.mxu1 %v493_v2  ;;  %p558_p5 = por %p557_p4, %p556_p3 }
  0x32   :  { %440 = vmatprep.subr.bf16.mxu0 %v494_v3  ;;  %469 = vmatprep.subr.bf16.mxu1 %v494_v3 }
  0x33   :  { %p559_p6 = pnand %p558_p5, %p552_p2 }
  0x35   :  { %441 = vmatpush3.bf16.msra.mxu0 %v494_v3  ;;  %477 = vmatpush3.bf16.msra.mxu1 %v494_v3 }
  0x36   :  { %442 = vmatprep.subr.bf16.mxu0 %v495_v5  ;;  %470 = vmatprep.subr.bf16.mxu1 %v495_v5 }
  0x39   :  { %443 = vmatpush3.bf16.msra.mxu0 %v495_v5  ;;  %478 = vmatpush3.bf16.msra.mxu1 %v495_v5 }
  0x3a   :  { %444 = vmatprep.subr.bf16.mxu0 %v496_v7  ;;  %471 = vmatprep.subr.bf16.mxu1 %v496_v7 }
  0x3d   :  { %445 = vmatpush3.bf16.msra.mxu0 %v496_v7  ;;  %479 = vmatpush3.bf16.msra.mxu1 %v496_v7 }
  0x3e   :  { %446 = vmatprep.subr.bf16.mxu0 %v497_v8  ;;  %472 = vmatprep.subr.bf16.mxu1 %v497_v8 }
  0x41   :  { %447 = vmatpush3.bf16.msra.mxu0 %v497_v8  ;;  %480 = vmatpush3.bf16.msra.mxu1 %v497_v8 }
  0x42   :  { %448 = vmatprep.subr.bf16.mxu0 %v498_v9  ;;  %473 = vmatprep.subr.bf16.mxu1 %v498_v9 }
  0x45   :  { %449 = vmatpush3.bf16.msra.mxu0 %v498_v9  ;;  %481 = vmatpush3.bf16.msra.mxu1 %v498_v9 }
  0x48   :  { %451 = vmatmul.mubr.bf16.vlgmr.msra.gmra.mrb[0].mxu0 %v500_v10  ;;  %459 = vmatmul.mubr.bf16.vlgmr.msra.gmra.mrb[0].mxu1 %v504_v11 }
  0x49   :  { %454 = vmatprep.mubr.bf16.mxu0 %v501_v12  ;;  %462 = vmatprep.mubr.bf16.mxu1 %v505_v13 }
  0x50   :  { %455 = vmatmul.mubr.bf16.gmra.mrb[4].mxu0 %v502_v14  ;;  %463 = vmatmul.mubr.bf16.gmra.mrb[4].mxu1 %v506_v15 }
 0x11b   :  { %v452_v17 = vpop.f32.mrb[0].mxu0  ;;  %v460_v18 = vpop.f32.mrb[0].mxu1 }
 0x11c   :  { %v226_v19 = vadd.f32 %v452_v17, %v401_v16  ;;  %v217_v20 = vpop.f32.mrb[1].mxu0  ;;  %v691_v21 = vadd.f32 %v460_v18, %v401_v16  ;;  %v249_v22 = vpop.f32.mrb[1].mxu1 }
 0x11d   :  { %v218_v23 = vadd.f32 %v401_v16, %v217_v20  ;;  %v453_v24 = vpop.f32.mrb[2].mxu0  ;;  %v693_v25 = vadd.f32 %v401_v16, %v249_v22  ;;  %v461_v26 = vpop.f32.mrb[2].mxu1 }
 0x11e   :  { %282 = vst [vmem:[#allocation7 + $0x10] sm:$0xff] %v226_v19  ;;  %v229_v27 = vadd.f32 %v453_v24, %v401_v16  ;;  %v220_v28 = vpop.f32.mrb[3].mxu0  ;;  %290 = vst [vmem:[#allocation7 + $0x50] sm:$0xff] %v691_v21  ;;  %v696_v29 = vadd.f32 %v461_v26, %v401_v16  ;;  %v252_v30 = vpop.f32.mrb[3].mxu1  ;;  %v320_v36 = vmul.f32 %v226_v19, %v226_v19 }
 0x11f   :  { %280 = vst [vmem:[#allocation7] sm:$0xff] %v218_v23  ;;  %v221_v31 = vadd.f32 %v401_v16, %v220_v28  ;;  %288 = vst [vmem:[#allocation7 + $0x40] sm:$0xff] %v693_v25  ;;  %v699_v32 = vadd.f32 %v401_v16, %v252_v30  ;;  %v318_v33 = vmul.f32 %v218_v23, %v218_v23 }
 0x120   :  { %283 = vst [vmem:[#allocation7 + $0x18] sm:$0xff] %v229_v27  ;;  %291 = vst [vmem:[#allocation7 + $0x58] sm:$0xff] %v696_v29  ;;  %v321_v41 = vmul.f32 %v229_v27, %v229_v27 }
 0x121   :  { %281 = vst [vmem:[#allocation7 + $0x8] sm:$0xff] %v221_v31  ;;  %v296_v34 = vadd.f32 %v221_v31, %v218_v23  ;;  %v319_v35 = vmul.f32 %v221_v31, %v221_v31  ;;  %289 = vst [vmem:[#allocation7 + $0x48] sm:$0xff] %v699_v32 }
 0x123   :  { %v297_v37 = vadd.f32 %v296_v34, %v226_v19  ;;  %v334_v38 = vadd.f32 %v319_v35, %v318_v33  ;;  %v456_v39 = vpop.f32.mrb[4].mxu0  ;;  %v464_v40 = vpop.f32.mrb[4].mxu1 }
 0x124   :  { %v242_v42 = vadd.f32 %v456_v39, %v401_v16  ;;  %v233_v43 = vpop.f32.mrb[5].mxu0  ;;  %v703_v44 = vadd.f32 %v464_v40, %v401_v16  ;;  %v265_v45 = vpop.f32.mrb[5].mxu1 }
 0x125   :  { %v335_v46 = vadd.f32 %v334_v38, %v320_v36  ;;  %v234_v47 = vadd.f32 %v401_v16, %v233_v43  ;;  %v298_v48 = vadd.f32 %v297_v37, %v229_v27  ;;  %v457_v49 = vpop.f32.mrb[6].mxu0  ;;  %v266_v50 = vadd.f32 %v401_v16, %v265_v45  ;;  %v465_v51 = vpop.f32.mrb[6].mxu1 }
 0x126   :  { %286 = vst [vmem:[#allocation7 + $0x30] sm:$0xff] %v242_v42  ;;  %v245_v52 = vadd.f32 %v457_v49, %v401_v16  ;;  %v236_v53 = vpop.f32.mrb[7].mxu0  ;;  %294 = vst [vmem:[#allocation7 + $0x70] sm:$0xff] %v703_v44  ;;  %v277_v54 = vadd.f32 %v465_v51, %v401_v16  ;;  %v268_v55 = vpop.f32.mrb[7].mxu1  ;;  %v324_v0 = vmul.f32 %v242_v42, %v242_v42 }
 0x127   :  { %284 = vst [vmem:[#allocation7 + $0x20] sm:$0xff] %v234_v47  ;;  %v299_v56 = vadd.f32 %v298_v48, %v234_v47  ;;  %v322_v57 = vmul.f32 %v234_v47, %v234_v47  ;;  %v336_v58 = vadd.f32 %v335_v46, %v321_v41  ;;  %v237_v59 = vadd.f32 %v401_v16, %v236_v53 }
 0x128   :  { %292 = vst [vmem:[#allocation7 + $0x60] sm:$0xff] %v266_v50  ;;  %287 = vst [vmem:[#allocation7 + $0x38] sm:$0xff] %v245_v52  ;;  %v269_v60 = vadd.f32 %v401_v16, %v268_v55 }
 0x129   :  { %295 = vst [vmem:[#allocation7 + $0x78] sm:$0xff] %v277_v54  ;;  %v337_v61 = vadd.f32 %v336_v58, %v322_v57  ;;  %285 = vst [vmem:[#allocation7 + $0x28] sm:$0xff] %v237_v59  ;;  %v300_v62 = vadd.f32 %v299_v56, %v237_v59  ;;  %v323_v63 = vmul.f32 %v237_v59, %v237_v59 }
 0x12a   :  { %293 = vst [vmem:[#allocation7 + $0x68] sm:$0xff] %v269_v60 }
 0x12b   :  { %v301_v1 = vadd.f32 %v300_v62, %v242_v42  ;;  %v338_v2 = vadd.f32 %v337_v61, %v323_v63 }
 0x12c   :  { %562 = shalt.err (!%p559_p6)
}
 0x12d   :  { %s563_s23 = scalar_lea.hbm %s775_s3, 2048 }
 0x12e   :  { %p564_p7 = scmp.ne.s32.totalorder %s775_s3, %s563_s23  ;;  %p567_p8 = scmp.lt.u32.totalorder %s563_s23, %s775_s3 }
 0x130   :  { %p569_p9 = pnand %p567_p8, %p564_p7 }
 0x132   :  { %572 = shalt.err (!%p569_p9)
}
 0x133   :  { %s630_s28 = smov 128   ;;  %s631_s29 = smov 8   ;;  %v325_v3 = vmul.f32 %v245_v52, %v245_v52  ;;  %v339_v4 = vadd.f32 %v338_v2, %v324_v0  ;;  %v302_v5 = vadd.f32 %v301_v1, %v245_v52  ;;  %v326_v6 = vmul.f32 %v693_v25, %v693_v25 }
 0x134   :  { %367 = dma.vmem_to_hbm [thread:$0]  %s706_s19, 2048, %s775_s3, [#allocation4], %s630_s28, %s630_s28, %s631_s29   ;;  %v327_v11 = vmul.f32 %v699_v32, %v699_v32  ;;  %v328_v12 = vmul.f32 %v691_v21, %v691_v21  ;;  %v329_v15 = vmul.f32 %v696_v29, %v696_v29  ;;  %v330_v18 = vmul.f32 %v266_v50, %v266_v50 }
 0x135   :  { %v303_v7 = vadd.f32 %v302_v5, %v693_v25  ;;  %v340_v8 = vadd.f32 %v339_v4, %v325_v3  ;;  %v331_v24 = vmul.f32 %v269_v60, %v269_v60  ;;  %v332_v25 = vmul.f32 %v703_v44, %v703_v44  ;;  %s632_s3 = smov [#allocation8]   ;;  %s633_s8 = smov [#allocation10]  }
 0x136   :  { %s374_s7 = sshll.u32 %s632_s3, 4  ;;  %s384_s9 = sshll.u32 %s633_s8, 4  ;;  %s375_s7 = int_to_ptr.vmem [resolvable:$true] %s374_s7  ;;  %s740_s9 = int_to_ptr.vmem [resolvable:$true] %s384_s9 }
 0x137   :  { %v341_v9 = vadd.f32 %v340_v8, %v326_v6  ;;  %v304_v10 = vadd.f32 %v303_v7, %v699_v32  ;;  %s573_s10 = scalar_lea.vmem %s375_s7, 16  ;;  %s577_s11 = scalar_lea.vmem %s375_s7, 32 }
 0x138   :  { %p574_p10 = scmp.ne.s32.totalorder %s375_s7, %s573_s10  ;;  %p578_p11 = scmp.lt.s32.totalorder %s375_s7, %s375_s7 }
 0x139   :  { %v305_v13 = vadd.f32 %v304_v10, %v691_v21  ;;  %v342_v14 = vadd.f32 %v341_v9, %v327_v11  ;;  %v333_v21 = vmul.f32 %v277_v54, %v277_v54  ;;  %p579_p12 = scmp.lt.s32.totalorder %s577_s11, %s573_s10 }
 0x13b   :  { %v343_v16 = vadd.f32 %v342_v14, %v328_v12  ;;  %v306_v17 = vadd.f32 %v305_v13, %v696_v29  ;;  %p580_p13 = por %p579_p12, %p578_p11 }
 0x13d   :  { %v307_v19 = vadd.f32 %v306_v17, %v266_v50  ;;  %v344_v20 = vadd.f32 %v343_v16, %v329_v15  ;;  %p581_p0 = pnand %p580_p13, %p574_p10 }
 0x13f   :  { %v345_v22 = vadd.f32 %v344_v20, %v330_v18  ;;  %v308_v23 = vadd.f32 %v307_v19, %v269_v60 }
 0x141   :  { %v309_v26 = vadd.f32 %v308_v23, %v703_v44  ;;  %v346_v27 = vadd.f32 %v345_v22, %v331_v24 }
 0x143   :  { %v310_v28 = vadd.f32 %v309_v26, %v277_v54  ;;  %v347_v30 = vadd.f32 %v346_v27, %v332_v25 }
 0x145   :  { %v348_v31 = vadd.f32 %v347_v30, %v333_v21  ;;  %v311_v32 = vrot.slane %v310_v28, 4 }
 0x147   :  { %v312_v33 = vadd.f32 %v311_v32, %v310_v28  ;;  %v349_v34 = vrot.slane %v348_v31, 4 }
 0x149   :  { %v313_v29 = vrot.slane %v312_v33, 2  ;;  %v350_v35 = vadd.f32 %v349_v34, %v348_v31 }
 0x14b   :  { %v314_v36 = vadd.f32 %v313_v29, %v312_v33  ;;  %v351_v37 = vrot.slane %v350_v35, 2 }
 0x14d   :  { %v315_v38 = vrot.slane %v314_v36, 1  ;;  %v352_v39 = vadd.f32 %v351_v37, %v350_v35 }
 0x14f   :  { %v316_v40 = vadd.f32 %v315_v38, %v314_v36  ;;  %v353_v41 = vrot.slane %v352_v39, 1 }
 0x151   :  { %317 = vst [vmem:[#allocation8] sm:$0x1] %v316_v40  ;;  %v354_v42 = vadd.f32 %v353_v41, %v352_v39 }
 0x152   :  { %584 = shalt.err (!%p581_p0)
}
 0x153   :  { %s585_s14 = scalar_lea.hbm %s776_s4, 16 }
 0x154   :  { %p586_p1 = scmp.ne.s32.totalorder %s776_s4, %s585_s14  ;;  %p589_p2 = scmp.lt.u32.totalorder %s585_s14, %s776_s4 }
 0x156   :  { %p591_p3 = pnand %p589_p2, %p586_p1 }
 0x158   :  { %594 = shalt.err (!%p591_p3)
}
 0x159   :  { %377 = dma.vmem_to_hbm [thread:$0]  %s375_s7, 16, %s776_s4, [#allocation9]   ;;  %355 = vst [vmem:[#allocation10] sm:$0x1] %v354_v42 }
 0x15a   :  { %s595_s2 = scalar_lea.vmem %s740_s9, 16  ;;  %s599_s19 = scalar_lea.vmem %s740_s9, 32 }
 0x15b   :  { %p596_p4 = scmp.ne.s32.totalorder %s740_s9, %s595_s2  ;;  %p600_p5 = scmp.lt.s32.totalorder %s740_s9, %s740_s9 }
 0x15c   :  { %p601_p6 = scmp.lt.s32.totalorder %s599_s19, %s595_s2 }
 0x15e   :  { %p602_p7 = por %p601_p6, %p600_p5 }
 0x160   :  { %p603_p8 = pnand %p602_p7, %p596_p4 }
 0x162   :  { %606 = shalt.err (!%p603_p8)
}
 0x163   :  { %s607_s22 = scalar_lea.hbm %s777_s5, 16 }
 0x164   :  { %p608_p9 = scmp.ne.s32.totalorder %s777_s5, %s607_s22  ;;  %p611_p10 = scmp.lt.u32.totalorder %s607_s22, %s777_s5 }
 0x166   :  { %p613_p11 = pnand %p611_p10, %p608_p9 }
 0x168   :  { %616 = shalt.err (!%p613_p11)
}
 0x169   :  { %387 = dma.vmem_to_hbm [thread:$0]  %s740_s9, 16, %s777_s5, [#allocation9]  }
 0x16a   :  { %621 = dma.done.wait [#allocation4], 2048  }
 0x16b   :  { %622 = vsyncadd [#allocation4], 4294965248 }
 0x16c   :  { %623 = dma.done.wait [#allocation9], 32  }
 0x16d   :  { %624 = vsyncadd [#allocation9], 4294967264 }
 0x16e   :  { %397 = vsyncpa [#allocation3], 1 }
 0x16f   :  { %398 = vsyncpa [#allocation6], 1 }
 0x170   :  { %399 = vsyncpa [#allocation4], 1 }
 0x171   :  { %400 = vsyncpa [#allocation9], 1 }

</bundles_post_ra>
